<compile_context>
chip_gen: v7x
topology: tpu7x:2x2x1
jax: 0.10.0
libtpu: 0.0.40
codegen_flags: <defaults>
</compile_context>

<pallas_src>
import jax
import jax.numpy as jnp
from jax.experimental import pallas as pl
from jax.experimental.pallas import tpu as pltpu


_LANES = 128            # full vreg lane width; slab last dim == tile last dim
_MIN_PALLAS_ROWS = 8    # below this a fused XLA add beats a standalone kernel


def _tile_byte_budget() -> int:
    """Per-buffer VMEM tile budget (bytes), sized to amortize per-step overhead."""
    try:
        kind = jax.devices()[0].device_kind.lower()
    except Exception:
        kind = ""
    if "v7" in kind:
        return 8 << 20   # ~3.2 TB/s HBM per TC: bigger tiles hide the ~0.35us step cost
    return 4 << 20       # v5e / v6e sweet spot (>=85% of HBM roofline measured)


def _scale_add_kernel(scale_ref, x_ref, o_ref):
    # scale_ref: SMEM (1,) float32 scalar (prefetched)
    # x_ref / o_ref: VMEM (tile_rows, _LANES) tiles of the flattened input
    o_ref[...] = x_ref[...] + scale_ref[0].astype(x_ref.dtype)


def scale_add(x, scale):
    """y = x + scale for an array of any shape."""
    orig_shape = x.shape
    n = int(x.size)
    dtype = x.dtype
    rows = n // _LANES

    # XLA fallback: empty, ragged (padding would add 2 extra HBM passes), tiny
    # (launch overhead dominates; XLA fuses with neighbors), or integer inputs
    # (PyTorch promotes int tensor + float scalar to float; let jnp handle it).
    if (n == 0 or n % _LANES != 0 or rows < _MIN_PALLAS_ROWS
            or not jnp.issubdtype(dtype, jnp.floating)):
        return x + scale

    itemsize = jnp.dtype(dtype).itemsize
    pack = max(8, 32 // itemsize)                       # sublane pack: 8/16/32

    budget = _tile_byte_budget()
    budget_rows = max(pack, (budget // (_LANES * itemsize)) // pack * pack)

    if rows <= pack:
        tile_rows = rows                                # single full-extent block
    else:
        # At least two blocks when possible (keeps both v7x TensorCores busy on
        # medium inputs); cap at the VMEM byte budget for large ones.
        half_rows = pl.cdiv(pl.cdiv(rows, 2), pack) * pack
        tile_rows = min(budget_rows, half_rows)

    grid = (pl.cdiv(rows, tile_rows),)                  # last block may be partial
    vmem_limit = max(32 << 20, 5 * budget)              # < v7x 64 MiB physical

    slab = x.reshape(rows, _LANES)
    scale_arr = jnp.asarray(scale, dtype=jnp.float32).reshape(1)

    # TODO(synk): optionally alias slab->output via input_output_aliases when
    # the caller can donate x (halves HBM footprint; not a throughput lever).
    out = pl.pallas_call(
        _scale_add_kernel,
        out_shape=jax.ShapeDtypeStruct((rows, _LANES), dtype),
        grid_spec=pltpu.PrefetchScalarGridSpec(
            num_scalar_prefetch=1,
            grid=grid,
            in_specs=[pl.BlockSpec((tile_rows, _LANES), lambda i, s: (i, 0))],
            out_specs=pl.BlockSpec((tile_rows, _LANES), lambda i, s: (i, 0)),
        ),
        compiler_params=pltpu.CompilerParams(
            dimension_semantics=("parallel",),
            vmem_limit_bytes=int(vmem_limit),
        ),
    )(scale_arr, slab)

    return out.reshape(orig_shape)


class Scale:
    """JAX/Pallas port of the PyTorch `Scale` module.

    Matches the reference forward exactly: `y = x + self.scale`
    (a scalar broadcast add applied to an input of any shape).
    """

    def __init__(self, scale: float = 1.0):
        self.name = type(self).__name__
        self.scale = float(scale)

    def __call__(self, x):
        return scale_add(x, self.scale)


if __name__ == "__main__":
    key = jax.random.PRNGKey(0)

    # Small shape from the module spec: 2*4*16*16 = 2048 elems -> 16 rows,
    # 2-block Pallas grid.
    x = jax.random.normal(key, (2, 4, 16, 16), dtype=jnp.float32)
    module = Scale(scale=1.0)
    y = jax.block_until_ready(module(x))
    assert y.shape == x.shape, y.shape
    assert jnp.allclose(y, x + 1.0, atol=0.0, rtol=0.0), "mismatch vs x + 1.0"

    # Medium shape: multi-row tiles, non-default scale.
    k1, k2 = jax.random.split(key)
    x2 = jax.random.normal(k1, (2, 4, 128, 256), dtype=jnp.float32)
    y2 = jax.block_until_ready(Scale(-2.5)(x2))
    assert y2.shape == x2.shape
    assert jnp.allclose(y2, x2 + (-2.5), atol=0.0, rtol=0.0), "mismatch vs x - 2.5"

    # bf16 input: exercises dtype-aware tile sizing (16-row sublane pack).
    x3 = jax.random.normal(k2, (4, 8, 32, 64), dtype=jnp.bfloat16)
    y3 = jax.block_until_ready(Scale(0.5)(x3))
    ref3 = x3 + jnp.asarray(0.5, dtype=jnp.bfloat16)
    assert jnp.allclose(y3, ref3, atol=0.0, rtol=0.0), "bf16 mismatch"

    # Ragged shape: takes the XLA fallback (no pad / slice passes).
    x4 = jax.random.normal(key, (3, 5, 7, 9), dtype=jnp.float32)
    y4 = jax.block_until_ready(Scale(2.0)(x4))
    assert y4.shape == x4.shape
    assert jnp.allclose(y4, x4 + 2.0, atol=0.0, rtol=0.0), "ragged mismatch"

    print("KERNEL_OK")
</pallas_src>

<mosaic_0001>
module attributes {stable_mosaic.version = 11 : i64} {
  func.func @_scale_add_kernel(%arg0: i32, %arg1: memref<1xf32, #tpu.memory_space<smem>>, %arg2: memref<8x128xf32, #tpu.memory_space<vmem>>, %arg3: memref<8x128xf32, #tpu.memory_space<vmem>>) attributes {dimension_semantics = [#tpu.dimension_semantics<parallel>], iteration_bounds = array<i64: 2>, scalar_prefetch = 1 : i64, scratch_operands = 0 : i64, tpu.core_type = #tpu.core_type<tc>, window_params = [{transform_indices = @transform_0, window_bounds = array<i64: 8, 128>}, {transform_indices = @transform_1, window_bounds = array<i64: 8, 128>}]} {
    %c0 = arith.constant 0 : index
    %c0_0 = arith.constant 0 : index
    %0 = vector.load %arg2[%c0, %c0_0] : memref<8x128xf32, #tpu.memory_space<vmem>>, vector<8x128xf32>
    %c0_1 = arith.constant 0 : index
    %1 = memref.load %arg1[%c0_1] : memref<1xf32, #tpu.memory_space<smem>>
    %2 = vector.broadcast %1 : f32 to vector<8x128xf32>
    %3 = arith.addf %0, %2 : vector<8x128xf32>
    %c0_2 = arith.constant 0 : index
    %c0_3 = arith.constant 0 : index
    %4 = vector.load %arg3[%c0_2, %c0_3] : memref<8x128xf32, #tpu.memory_space<vmem>>, vector<8x128xf32>
    tpu.vector_store %arg3[%c0_2, %c0_3], %3 {strides = array<i32>} : memref<8x128xf32, #tpu.memory_space<vmem>>, vector<8x128xf32>,
    return
  }
  func.func @transform_0(%arg0: i32, %arg1: memref<1xf32, #tpu.memory_space<smem>>) -> (i32, i32) {
    %c0_i32 = arith.constant 0 : i32
    %c0_i32_0 = arith.constant 0 : i32
    return %arg0, %c0_i32 : i32, i32
  }
  func.func @transform_1(%arg0: i32, %arg1: memref<1xf32, #tpu.memory_space<smem>>) -> (i32, i32) {
    %c0_i32 = arith.constant 0 : i32
    %c0_i32_0 = arith.constant 0 : i32
    return %arg0, %c0_i32 : i32, i32
  }
}

</mosaic_0001>

<bundles_post_ra>
// kernel: tpu_custom_call.1
= control target key start
LH: loop header
LB: loop body
LE: loop exit
PB: predicated region body
PF: predicated region fallthrough
CT: control target
= control target key end

     0   :  { %s560_s0 = inlined_call_operand.<no memory space> [shape: f32[1], index: 0, kind: input, shape index: {}]   ;;  %s561_s1 = inlined_call_operand.hbm [shape: f32[16,128], index: 1, kind: input, shape index: {}]   ;;  %s562_s2 = inlined_call_operand.hbm [shape: f32[16,128], index: 2, kind: output, shape index: {}]  }
   0x1   :  { %7 = sst [smem:[#allocation3]] %s560_s0 }
   0x2   :  { %8 = vsyncpa [#allocation5], 0 }
   0x3   :  { %10 = vsyncpa [#allocation5 + $0x1], 0 }
   0x4   :  { %11 = vsyncpa [#allocation6], 0 }
   0x5   :  { %13 = vsyncpa [#allocation6 + $0x1], 0  ;;  %s399_s11 = smov 0   ;;  %s401_s12 = smov 0  }
   0x6   :  { %s403_s13 = smov 0   ;;  %s405_s14 = smov 0  }
   0x7 LB: > { %s420_s0 = sadd.s32 4294967295, %s377_s14   ;;  %s223_s15 = sadd.s32 4294967294, %s377_s14   ;;  %s377_s14 = sphi %s405_s14, %s577_s14   ;;  %s373_s13 = sphi %s403_s13, %s576_s13   ;;  %s369_s12 = sphi %s401_s12, %s575_s12   ;;  %s365_s11 = sphi %s399_s11, %s574_s11  }
   0x8   : > { %s424_s16 = sadd.s32 1, %s377_s14   ;;  %s26_s17 = sadd.s32 1, %s373_s13 }
   0x9   : > { %s23_s18 = ssub.s32 %s377_s14, %s424_s16  ;;  %p33_p0 = scmp.ne.s32.totalorder %s373_s13, %s369_s12 }
   0xa   : > { %p24_p1 = scmp.eq.s32.totalorder %s23_s18, 0  ;;  %p34_p2 = scmp.eq.s32.totalorder %s377_s14, 0 }
   0xb   : > { %p39_p3 = scmp.ne.s32.totalorder %s369_s12, %s365_s11  ;;  %p40_p4 = scmp.eq.s32.totalorder %s420_s0, 0 }
   0xc   : > { %s436_s19 = scalar_select %p24_p1, %s373_s13, %s26_s17  }
   0xd   : > { %p438_p5 = por %p34_p2, %p33_p0  ;;  %p442_p6 = por %p40_p4, %p39_p3 }
   0xe   : > { %p63_p7 = scmp.eq.s32.totalorder %s420_s0, 1  ;;  %p69_p8 = scmp.eq.s32.totalorder %s223_s15, 1 }
   0xf   : > { %p247_p10 = scmp.lt.s32.totalorder %s377_s14, 2  ;;  %s89_s24 = sand.u32 1, %s373_s13  }
  0x10   : > { %p449_p11 = por %p63_p7, %p33_p0  ;;  %p453_p12 = por %p69_p8, %p39_p3 }
  0x11   : > { %s227_s25 = sshll.u32 %s377_s14, 7  ;;  %s226_s26 = sshll.u32 %s89_s24, 3 }
  0x12   : > { %s566_s22 = scalar_select %p449_p11, 1, 0 }
  0x13   : > { %s567_s23 = scalar_select %p453_p12, 1, 0 }
  0x14   : > { %s462_s29 = scalar_lea.hbm %s561_s1, %s227_s25  ;;  %s93_s30 = scalar_lea.vmem [#allocation4], %s226_s26 }
  0x15   : > { %s100_s3 = sshll.u32 %s93_s30, 4  ;;  %p466_p13 = pnand %p247_p10, %p438_p5  ;;  %s470_s3 = int_to_ptr.vmem [resolvable:$true] %s100_s3 }
  0x16   : > { %s90_s5 = scalar_lea.sflag [#allocation5], %s89_s24  ;;  %s281_s6 = scalar_lea.hbm %s462_s29, 128 }
  0x17   : > { %p282_p2 = scmp.ne.s32.totalorder %s462_s29, %s281_s6  ;;  %p283_p3 = pneg %p466_p13 }
  0x18   : > { %s286_s9 = scalar_lea.hbm %s561_s1, 256  ;;  %p287_p5 = scmp.lt.u32.totalorder %s462_s29, %s561_s1 }
  0x19   : > { %p284_p4 = pnand %p283_p3, %p282_p2  ;;  %p288_p8 = scmp.lt.u32.totalorder %s286_s9, %s281_s6 }
  0x1a   : > { %p290_p9 = scmp.lt.u32.totalorder %s281_s6, %s462_s29 }
  0x1b   : > { %p285_p7 = pneg %p284_p4  ;;  %p289_p10 = por %p288_p8, %p287_p5 }
  0x1d   : > { %p291_p0 = por %p290_p9, %p289_p10 }
  0x1f   : > { %p292_p1 = pnand %p291_p0, %p285_p7 }
  0x21   : > { %295 = shalt.err (!%p292_p1)
}
  0x22   : > { %s296_s17 = scalar_lea.vmem %s470_s3, 128  ;;  %s379_s18 = smov [#allocation4]  }
  0x23   : > { %p297_p2 = scmp.ne.s32.totalorder %s470_s3, %s296_s17  ;;  %s301_s20 = sshll.u32 %s379_s18, 4  ;;  %s302_s20 = int_to_ptr.vmem [resolvable:$false] %s301_s20 }
  0x24   : > { %s303_s24 = scalar_lea.vmem %s302_s20, 256  ;;  %p304_p11 = scmp.lt.s32.totalorder %s470_s3, %s302_s20 }
  0x25   : > { %p299_p4 = pnand %p297_p2, %p283_p3  ;;  %p305_p5 = scmp.lt.s32.totalorder %s303_s24, %s296_s17 }
  0x27   : > { %p300_p12 = pneg %p299_p4  ;;  %p306_p8 = por %p305_p5, %p304_p11 }
  0x29   : > { %p307_p9 = pnand %p306_p8, %p300_p12 }
  0x2b   : > { %310 = shalt.err (!%p307_p9)
}
  0x2c   : > { %242 = dma.hbm_to_vmem [thread:$0]  (!%p466_p13), %s462_s29, 128, %s470_s3, %s90_s5  }
  0x2d   : > { %p569_p0 = scmp.lt.s32.totalorder %s377_s14, 3  ;;  %p570_p1 = scmp.ge.s32.totalorder %s377_s14, 1 }
  0x2f   : > { %p106_p3 = pnand %p570_p1, %p569_p0 }
  0x30   : > { %s504_s25 = sand.u32 (!%p106_p3), 1, %s369_s12  }
  0x31   : > { %109 = sbr.rel (%p106_p3) target bundleno = 83 (0x53), region = 24  ;;  %s229_s26 = sshll.u32 (!%p106_p3), %s504_s25, 3 }
  0x32   : > { %s112_s27 = scalar_lea.sflag (!%p106_p3), [#allocation5], %s504_s25  ;;  %s115_s28 = scalar_lea.vmem (!%p106_p3), [#allocation4], %s229_s26 }
  0x38   : > { %356 = dma.done.wait (%p442_p6), %s112_s27, 128  }
  0x39   : > { %358 = vsyncadd (%p442_p6), %s112_s27, 4294967168  ;;  %s135_s29 = sld [smem:[#allocation3]]  ;;  %s133_s30 = scalar_lea.vmem [#allocation7], %s229_s26  ;;  %v134_v0 = vld [vmem:[%s115_s28] sm:$0xff] }
  0x3a   : > { %s153_s3 = sshll.u32 %s133_s30, 4  ;;  %s232_s4 = sshll.u32 %s420_s0, 7  ;;  %s513_s3 = int_to_ptr.vmem [resolvable:$true] %s153_s3 }
  0x3b   : > { %s518_s21 = scalar_lea.hbm %s562_s2, %s232_s4  ;;  %s140_s7 = scalar_lea.sflag [#allocation6], %s504_s25 }
  0x3c   : > { %s311_s8 = scalar_lea.vmem %s513_s3, 128  ;;  %p571_p11 = scmp.ne.s32.totalorder %s566_s22, 0 }
  0x3d   : > { %p312_p6 = scmp.ne.s32.totalorder %s513_s3, %s311_s8  ;;  %s380_s0 = smov [#allocation7]  }
  0x3e   : > { %s315_s9 = sshll.u32 %s380_s0, 4  ;;  %s316_s9 = int_to_ptr.vmem [resolvable:$false] %s315_s9 }
  0x3f   : > { %v136_v1 = vstv %s135_s29  ;;  %p313_p12 = pnand %p312_p6, %p571_p11  ;;  %s317_s10 = scalar_lea.vmem %s316_s9, 256 }
  0x40   : > { %v137_v2 = vadd.f32 %v136_v1, %v134_v0  ;;  %p318_p7 = scmp.lt.s32.totalorder %s513_s3, %s316_s9  ;;  %p319_p10 = scmp.lt.s32.totalorder %s317_s10, %s311_s8 }
  0x41   : > { %p314_p13 = pneg %p313_p12 }
  0x42   : > { %138 = vst [vmem:[%s133_s30] sm:$0xff] %v137_v2  ;;  %p320_p2 = por %p319_p10, %p318_p7 }
  0x44   : > { %p321_p4 = pnand %p320_p2, %p314_p13 }
  0x46   : > { %324 = shalt.err (!%p321_p4)
}
  0x47   : > { %s325_s15 = scalar_lea.hbm %s518_s21, 128  ;;  %s329_s20 = scalar_lea.hbm %s562_s2, 256 }
  0x48   : > { %p326_p5 = scmp.ne.s32.totalorder %s518_s21, %s325_s15  ;;  %p330_p0 = scmp.lt.u32.totalorder %s518_s21, %s562_s2 }
  0x49   : > { %p331_p1 = scmp.lt.u32.totalorder %s329_s20, %s325_s15  ;;  %p333_p6 = scmp.lt.u32.totalorder %s325_s15, %s518_s21 }
  0x4a   : > { %p327_p8 = pnand %p326_p5, %p571_p11 }
  0x4b   : > { %p332_p3 = por %p331_p1, %p330_p0 }
  0x4c   : > { %p328_p9 = pneg %p327_p8 }
  0x4d   : > { %p334_p12 = por %p333_p6, %p332_p3 }
  0x4f   : > { %p335_p13 = pnand %p334_p12, %p328_p9 }
  0x51   : > { %338 = shalt.err (!%p335_p13)
}
  0x52   : > { %237 = dma.vmem_to_hbm [thread:$0]  (%p571_p11), %s513_s3, 128, %s518_s21, %s140_s7  }
  0x53 PF: > { %s165_s26 = sand.u32 1, %s365_s11   ;;  %p572_p7 = scmp.ne.s32.totalorder %s567_s23, 0 }
  0x54   : > { %p573_p10 = scmp.ge.s32.totalorder %s377_s14, 2  ;;  %s166_s27 = scalar_lea.sflag [#allocation6], %s165_s26 }
  0x56   : > { %p244_p2 = pnand %p573_p10, %p572_p7 }
  0x58   : > { %360 = dma.done.wait (!%p244_p2), %s166_s27, 128  }
  0x59   : > { %362 = vsyncadd (!%p244_p2), %s166_s27, 4294967168  ;;  %p16_p4 = scmp.ge.s32.totalorder %s424_s16, 4   ;;  %s574_s11 = smov %s369_s12 }
  0x5a   : > { %s575_s12 = smov %s373_s13  ;;  %s576_s13 = smov %s436_s19 }
  0x5b   : > { %s577_s14 = smov %s424_s16  ;;  %18 = sbr.rel (!%p16_p4) target bundleno = 7 (0x7), region = 69 }
  0x62   :  { %171 = vsyncpa [#allocation5], 1 }
  0x63   :  { %173 = vsyncpa [#allocation5 + $0x1], 1 }
  0x64   :  { %174 = vsyncpa [#allocation6], 1 }
  0x65   :  { %176 = vsyncpa [#allocation6 + $0x1], 1 }

</bundles_post_ra>
